<compile_context>
chip_gen: v7x
topology: tpu7x:2x2x1
jax: 0.10.0
libtpu: 0.0.40
codegen_flags: <defaults>
</compile_context>

<pallas_src>
import jax
import jax.numpy as jnp
from jax import lax
from jax.experimental import pallas as pl
from jax.experimental.pallas import tpu as pltpu


def _round_up(x, m):
    return ((x + m - 1) // m) * m


# ----------------------------- kernels ------------------------------------ #

def _head_fwd_kernel(emb_ref, wt_ref, b_ref, out_ref):
    # emb_ref: (tm, E_pad)  compute dtype   (gathered embeddings, pipelined input)
    # wt_ref:  (E_pad, V)   compute dtype   (pre-transposed linear weight, resident)
    # b_ref:   (1, V)       f32
    # out_ref: (tm, V)      f32             (true vocab width -- no padded lanes)
    out_ref[...] = (jnp.dot(emb_ref[...], wt_ref[...],
                            preferred_element_type=jnp.float32)
                    + b_ref[...]).astype(out_ref.dtype)


def _per_row_nll(logits, tgt_ref):
    # logits: (tm, V) f32; tgt_ref: (tm, 1) int32 -> (tm, 1) f32 per-row NLL.
    # V is unpadded, so no vocab mask is needed in the LSE.
    m = jnp.max(logits, axis=-1, keepdims=True)
    lse = m + jnp.log(jnp.sum(jnp.exp(logits - m), axis=-1, keepdims=True))
    col = lax.broadcasted_iota(jnp.int32, logits.shape, 1)
    tgt_logit = jnp.sum(jnp.where(col == tgt_ref[...], logits, 0.0),
                        axis=-1, keepdims=True)
    return lse - tgt_logit


def _head_loss_kernel(emb_ref, tgt_ref, wt_ref, b_ref, out_ref, nll_ref):
    logits = jnp.dot(emb_ref[...], wt_ref[...],
                     preferred_element_type=jnp.float32) + b_ref[...]
    out_ref[...] = logits.astype(out_ref.dtype)
    nll_ref[...] = _per_row_nll(logits, tgt_ref)


def _head_loss_only_kernel(emb_ref, tgt_ref, wt_ref, b_ref, nll_ref):
    # Same as above but never writes the (tm, V) logits back to HBM.
    logits = jnp.dot(emb_ref[...], wt_ref[...],
                     preferred_element_type=jnp.float32) + b_ref[...]
    nll_ref[...] = _per_row_nll(logits, tgt_ref)


# ----------------------------- sizing -------------------------------------- #

_MAX_TM = 2048  # rows per tile cap


def _pick_row_tile(bs, e_pad, v):
    """Pick the row-tile so the double-buffered streamed tiles stay within budget."""
    per_row = 2 * 4 * (e_pad + v + 1 + 1)   # emb + logits + tgt + nll, f32, 2 bufs
    budget = 24 << 20                       # bytes for streamed (pipelined) tiles
    tm = (budget // per_row) // 8 * 8
    tm = max(8, min(_MAX_TM, int(tm)))
    if bs <= tm:
        return bs                            # single tile: block dims == full dims
    return tm


def _vmem_limit_bytes(tm, e_pad, v):
    pipelined = 2 * 4 * tm * (e_pad + v + 1 + 1)      # double-buffered streamed tiles
    resident = 2 * 4 * (e_pad * v + v)                # wt + bias (assume 2 buffers)
    need = pipelined + resident + (4 << 20)           # compiler headroom
    # Floor at 32 MiB (>= default everywhere), cap below v7x's 64 MiB physical.
    return int(min(max(need, 32 << 20), 50 << 20))


# ----------------------------- wrappers ------------------------------------ #

def prepare_params(params, compute_dtype=jnp.float32):
    """One-time param prep (outside the per-call hot path): E padding + transpose."""
    table = jnp.asarray(params["table"], jnp.float32)      # (V, E)
    w = jnp.asarray(params["w"], jnp.float32)               # (V, E)  nn.Linear layout
    b = jnp.asarray(params["b"], jnp.float32)               # (V,)
    V, E = table.shape
    E_pad = _round_up(E, 128)
    table_p = jnp.zeros((V, E_pad), compute_dtype).at[:, :E].set(
        table.astype(compute_dtype))
    wt = jnp.zeros((E_pad, V), compute_dtype).at[:E, :].set(
        w.T.astype(compute_dtype))
    bias = b[None, :]                                        # (1, V) f32
    return {"table": table_p, "wt": wt, "bias": bias,
            "V": V, "E": E, "E_pad": E_pad}


def charv2_forward(x, prepared, targets=None, return_logits=True):
    """x: (B, S) int tokens. Returns (logits, loss) with CharV2.forward semantics:
    logits is (B, S, V) when targets is None, (B*S, V) otherwise; loss is the mean
    cross-entropy (or None).  return_logits=False (targets path only) skips the
    logits HBM writeback and returns (None, loss)."""
    B, S = x.shape
    BS = B * S
    V, E_pad = prepared["V"], prepared["E_pad"]
    table, wt, bias = prepared["table"], prepared["wt"], prepared["bias"]

    # Vectorized embedding lookup (XLA gather); feeds the kernel as a pipelined
    # (tm, E_pad) input instead of an in-kernel serialized row-copy loop.
    emb = jnp.take(table, x.reshape(BS).astype(jnp.int32), axis=0)   # (BS, E_pad)

    tm = _pick_row_tile(BS, E_pad, V)
    BS_pad = BS if BS <= tm else _round_up(BS, tm)
    if BS_pad != BS:
        emb = jnp.concatenate(
            [emb, jnp.zeros((BS_pad - BS, E_pad), emb.dtype)], axis=0)
    num_tiles = BS_pad // tm

    row = lambda i: (i, 0)
    const = lambda i: (0, 0)

    emb_spec = pl.BlockSpec((tm, E_pad), row)
    wt_spec = pl.BlockSpec((E_pad, V), const)
    b_spec = pl.BlockSpec((1, V), const)
    out_spec = pl.BlockSpec((tm, V), row)
    nll_spec = pl.BlockSpec((tm, 1), row)

    cparams = pltpu.CompilerParams(
        dimension_semantics=("parallel",),                  # per-row outputs -> no
        vmem_limit_bytes=_vmem_limit_bytes(tm, E_pad, V))   # cross-step accumulation

    if targets is None:
        logits = pl.pallas_call(
            _head_fwd_kernel,
            out_shape=jax.ShapeDtypeStruct((BS_pad, V), jnp.float32),
            grid=(num_tiles,),
            in_specs=[emb_spec, wt_spec, b_spec],
            out_specs=out_spec,
            compiler_params=cparams,
        )(emb, wt, bias)
        if BS_pad != BS:
            logits = logits[:BS]
        return logits.reshape(B, S, V), None

    tgt = targets.reshape(BS, 1).astype(jnp.int32)
    if BS_pad != BS:
        tgt = jnp.concatenate(
            [tgt, jnp.zeros((BS_pad - BS, 1), jnp.int32)], axis=0)

    if return_logits:
        logits, nll = pl.pallas_call(
            _head_loss_kernel,
            out_shape=(jax.ShapeDtypeStruct((BS_pad, V), jnp.float32),
                       jax.ShapeDtypeStruct((BS_pad, 1), jnp.float32)),
            grid=(num_tiles,),
            in_specs=[emb_spec, nll_spec, wt_spec, b_spec],   # tgt uses (tm,1) block
            out_specs=(out_spec, nll_spec),
            compiler_params=cparams,
        )(emb, tgt, wt, bias)
        loss = jnp.mean(nll[:BS, 0])
        if BS_pad != BS:
            logits = logits[:BS]
        return logits, loss

    nll = pl.pallas_call(
        _head_loss_only_kernel,
        out_shape=jax.ShapeDtypeStruct((BS_pad, 1), jnp.float32),
        grid=(num_tiles,),
        in_specs=[emb_spec, nll_spec, wt_spec, b_spec],
        out_specs=nll_spec,
        compiler_params=cparams,
    )(emb, tgt, wt, bias)
    return None, jnp.mean(nll[:BS, 0])


def init_params(key, vocab_size, emb_dim):
    k1, k2, k3 = jax.random.split(key, 3)
    # nn.Embedding default: N(0, 1); nn.Linear default: U(-1/sqrt(E), 1/sqrt(E)).
    table = jax.random.normal(k1, (vocab_size, emb_dim), jnp.float32)
    bound = 1.0 / jnp.sqrt(emb_dim)
    w = jax.random.uniform(k2, (vocab_size, emb_dim), jnp.float32, -bound, bound)
    b = jax.random.uniform(k3, (vocab_size,), jnp.float32, -bound, bound)
    return {"table": table, "w": w, "b": b}


# ----------------------------- reference ----------------------------------- #

def charv2_forward_ref(x, params, targets=None):
    table, w, b = params["table"], params["w"], params["b"]
    emb = table[x]                                       # (B, S, E)
    logits = jnp.einsum("bse,ve->bsv", emb, w) + b       # (B, S, V)
    if targets is None:
        return logits, None
    B, S, V = logits.shape
    lf = logits.reshape(B * S, V)
    tf = targets.reshape(B * S)
    lse = jax.nn.logsumexp(lf, axis=-1)
    loss = jnp.mean(lse - lf[jnp.arange(B * S), tf])
    return lf, loss


# ------------------------------- main --------------------------------------- #

if __name__ == "__main__":
    B, S = 2, 8
    vocab_size, context_size, emb_dim = 32, S, 16

    key = jax.random.PRNGKey(0)
    kp, kx, kt = jax.random.split(key, 3)
    params = init_params(kp, vocab_size, emb_dim)
    prepared = prepare_params(params)          # one-time prep, outside the hot path

    x = jax.random.randint(kx, (B, S), 0, vocab_size, jnp.int32)
    targets = jax.random.randint(kt, (B, S), 0, vocab_size, jnp.int32)

    fwd = jax.jit(lambda x_: charv2_forward(x_, prepared, None))
    fwd_loss = jax.jit(lambda x_, t_: charv2_forward(x_, prepared, t_))
    loss_only = jax.jit(lambda x_, t_: charv2_forward(x_, prepared, t_,
                                                      return_logits=False))

    # No-targets path: logits (B, S, V), loss None.
    logits, loss = fwd(x)
    logits = jax.block_until_ready(logits)
    assert loss is None
    logits_ref, _ = charv2_forward_ref(x, params, None)
    assert jnp.allclose(logits, logits_ref, atol=1e-4, rtol=1e-4)

    # With-targets path (fused per-row cross-entropy): logits (B*S, V), mean loss.
    logits2, loss2 = fwd_loss(x, targets)
    loss2 = jax.block_until_ready(loss2)
    logits2_ref, loss2_ref = charv2_forward_ref(x, params, targets)
    assert jnp.allclose(logits2, logits2_ref, atol=1e-4, rtol=1e-4)
    assert jnp.allclose(loss2, loss2_ref, atol=1e-4, rtol=1e-4)

    # Loss-only path (skips the logits HBM writeback entirely).
    logits3, loss3 = loss_only(x, targets)
    loss3 = jax.block_until_ready(loss3)
    assert logits3 is None
    assert jnp.allclose(loss3, loss2_ref, atol=1e-4, rtol=1e-4)

    # TODO(synk): generate() is an autoregressive torch.multinomial sampling loop
    # (host-side control flow + RNG); not a kernel hot path, left out.

    print("KERNEL_OK")
</pallas_src>

<mosaic_0001>
module attributes {stable_mosaic.version = 11 : i64} {
  func.func @_head_fwd_kernel(%arg0: i32, %arg1: memref<16x128xf32, #tpu.memory_space<vmem>>, %arg2: memref<128x32xf32, #tpu.memory_space<vmem>>, %arg3: memref<1x32xf32, #tpu.memory_space<vmem>>, %arg4: memref<16x32xf32, #tpu.memory_space<vmem>>) attributes {dimension_semantics = [#tpu.dimension_semantics<parallel>], iteration_bounds = array<i64: 1>, scalar_prefetch = 0 : i64, scratch_operands = 0 : i64, tpu.core_type = #tpu.core_type<tc>, window_params = [{transform_indices = @transform_0, window_bounds = array<i64: 16, 128>}, {pipeline_mode = #tpu.pipeline_mode<synchronous>, transform_indices = @transform_1, window_bounds = array<i64: 128, 32>}, {pipeline_mode = #tpu.pipeline_mode<synchronous>, transform_indices = @transform_2, window_bounds = array<i64: 1, 32>}, {transform_indices = @transform_3, window_bounds = array<i64: 16, 32>}]} {
    %c0 = arith.constant 0 : index
    %c0_0 = arith.constant 0 : index
    %0 = vector.load %arg1[%c0, %c0_0] : memref<16x128xf32, #tpu.memory_space<vmem>>, vector<16x128xf32>
    %c0_1 = arith.constant 0 : index
    %c0_2 = arith.constant 0 : index
    %1 = vector.load %arg2[%c0_1, %c0_2] : memref<128x32xf32, #tpu.memory_space<vmem>>, vector<128x32xf32>
    %cst = arith.constant dense<0.000000e+00> : vector<16x32xf32>
    %2 = tpu.matmul %0, %1, %cst {dimension_numbers = #tpu.dot_dimension_numbers<[1], [0], [0], [1], [0, 0, 1, 1], [], []>} : vector<16x128xf32>, vector<128x32xf32>, vector<16x32xf32> -> vector<16x32xf32>
    %c0_3 = arith.constant 0 : index
    %c0_4 = arith.constant 0 : index
    %3 = vector.load %arg3[%c0_3, %c0_4] : memref<1x32xf32, #tpu.memory_space<vmem>>, vector<1x32xf32>
    %4 = vector.broadcast %3 : vector<1x32xf32> to vector<16x32xf32>
    %5 = arith.addf %2, %4 : vector<16x32xf32>
    %c0_5 = arith.constant 0 : index
    %c0_6 = arith.constant 0 : index
    %6 = vector.load %arg4[%c0_5, %c0_6] : memref<16x32xf32, #tpu.memory_space<vmem>>, vector<16x32xf32>
    tpu.vector_store %arg4[%c0_5, %c0_6], %5 {strides = array<i32>} : memref<16x32xf32, #tpu.memory_space<vmem>>, vector<16x32xf32>,
    return
  }
  func.func @transform_0(%arg0: i32) -> (i32, i32) {
    %c0_i32 = arith.constant 0 : i32
    %c0_i32_0 = arith.constant 0 : i32
    return %arg0, %c0_i32 : i32, i32
  }
  func.func @transform_1(%arg0: i32) -> (i32, i32) {
    %c0_i32 = arith.constant 0 : i32
    %c0_i32_0 = arith.constant 0 : i32
    %c0_i32_1 = arith.constant 0 : i32
    return %c0_i32, %c0_i32_0 : i32, i32
  }
  func.func @transform_2(%arg0: i32) -> (i32, i32) {
    %c0_i32 = arith.constant 0 : i32
    %c0_i32_0 = arith.constant 0 : i32
    %c0_i32_1 = arith.constant 0 : i32
    return %c0_i32, %c0_i32_0 : i32, i32
  }
  func.func @transform_3(%arg0: i32) -> (i32, i32) {
    %c0_i32 = arith.constant 0 : i32
    %c0_i32_0 = arith.constant 0 : i32
    return %arg0, %c0_i32 : i32, i32
  }
}

</mosaic_0001>

<bundles_post_ra>
// kernel: _lambda_.1
= control target key start
LH: loop header
LB: loop body
LE: loop exit
PB: predicated region body
PF: predicated region fallthrough
CT: control target
= control target key end

     0   :  { %s339_s0 = inlined_call_operand.vmem [shape: f32[16,128], index: 0, kind: input, shape index: {}]   ;;  %s340_s1 = inlined_call_operand.vmem [shape: f32[128,32], index: 1, kind: input, shape index: {}]   ;;  %s341_s2 = inlined_call_operand.vmem [shape: f32[1,32], index: 2, kind: input, shape index: {}]   ;;  %s342_s3 = inlined_call_operand.hbm [shape: f32[16,32], index: 3, kind: output, shape index: {}]  }
   0x1   :  { %v17_v0 = vld [vmem:[%s340_s1] sm:$0xff]  ;;  %v18_v1 = vld [vmem:[%s340_s1 + $0x8] sm:$0xff]  ;;  %v19_v2 = vld [vmem:[%s340_s1 + $0x10] sm:$0xff] }
   0x2   :  { %v188_v3 = vpack.c.bf16 %v18_v1, %v17_v0  ;;  %v20_v4 = vld [vmem:[%s340_s1 + $0x18] sm:$0xff]  ;;  %v21_v6 = vld [vmem:[%s340_s1 + $0x20] sm:$0xff]  ;;  %v22_v7 = vld [vmem:[%s340_s1 + $0x28] sm:$0xff] }
   0x3   :  { %v192_v5 = vpack.c.bf16 %v20_v4, %v19_v2  ;;  %v196_v8 = vpack.c.bf16 %v22_v7, %v21_v6  ;;  %v15_v9 = vld [vmem:[%s339_s0] sm:$0xff]  ;;  %v23_v10 = vld [vmem:[%s340_s1 + $0x30] sm:$0xff]  ;;  %v24_v11 = vld [vmem:[%s340_s1 + $0x38] sm:$0xff] }
   0x4   :  { %189 = vmatprep.subr.bf16.mxu0 %v188_v3  ;;  %185 = vmatprep.mubr.f32.mxu0 %v15_v9 }
   0x5   :  { %191 = vmatpush3.bf16.msra.mxu0 %v188_v3 }
   0x6   :  { %193 = vmatprep.subr.bf16.mxu0 %v192_v5 }
   0x7   :  { %8 = vsyncpa [#allocation3], 0  ;;  %v200_v12 = vpack.c.bf16 %v24_v11, %v23_v10  ;;  %v25_v13 = vld [vmem:[%s340_s1 + $0x40] sm:$0xff]  ;;  %v26_v14 = vld [vmem:[%s340_s1 + $0x48] sm:$0xff]  ;;  %s247_s23 = smov [#allocation2]   ;;  %vm115_vm0 = vcmask 261120  }
   0x8   :  { %v204_v15 = vpack.c.bf16 %v26_v14, %v25_v13  ;;  %v27_v16 = vld [vmem:[%s340_s1 + $0x50] sm:$0xff]  ;;  %v28_v17 = vld [vmem:[%s340_s1 + $0x58] sm:$0xff]  ;;  %v29_v19 = vld [vmem:[%s340_s1 + $0x60] sm:$0xff]  ;;  %s123_s24 = sshll.u32 %s247_s23, 4  ;;  %s124_s24 = int_to_ptr.vmem [resolvable:$true] %s123_s24 }
   0x9   :  { %195 = vmatpush3.bf16.msra.mxu0 %v192_v5  ;;  %v208_v18 = vpack.c.bf16 %v28_v17, %v27_v16  ;;  %v30_v20 = vld [vmem:[%s340_s1 + $0x68] sm:$0xff]  ;;  %v31_v22 = vld [vmem:[%s340_s1 + $0x70] sm:$0xff]  ;;  %v32_v23 = vld [vmem:[%s340_s1 + $0x78] sm:$0xff]  ;;  %s223_s1 = scalar_lea.vmem %s124_s24, 256  ;;  %p228_p1 = scmp.lt.s32.totalorder %s124_s24, %s124_s24 }
   0xa   :  { %197 = vmatprep.subr.bf16.mxu0 %v196_v8  ;;  %v212_v21 = vpack.c.bf16 %v30_v20, %v29_v19  ;;  %v216_v24 = vpack.c.bf16 %v32_v23, %v31_v22  ;;  %v16_v25 = vld [vmem:[%s339_s0 + $0x8] sm:$0xff]  ;;  %v134_v26 = vld [vmem:[%s341_s2] ss:$0 sm:$0xff]  ;;  %p224_p0 = scmp.ne.s32.totalorder %s124_s24, %s223_s1  ;;  %p229_p2 = scmp.lt.s32.totalorder %s223_s1, %s223_s1 }
   0xc   :  { %p230_p3 = por %p229_p2, %p228_p1 }
   0xd   :  { %199 = vmatpush3.bf16.msra.mxu0 %v196_v8 }
   0xe   :  { %201 = vmatprep.subr.bf16.mxu0 %v200_v12  ;;  %p231_p4 = pnand %p230_p3, %p224_p0 }
  0x11   :  { %203 = vmatpush3.bf16.msra.mxu0 %v200_v12 }
  0x12   :  { %205 = vmatprep.subr.bf16.mxu0 %v204_v15 }
  0x15   :  { %207 = vmatpush3.bf16.msra.mxu0 %v204_v15 }
  0x16   :  { %209 = vmatprep.subr.bf16.mxu0 %v208_v18 }
  0x19   :  { %211 = vmatpush3.bf16.msra.mxu0 %v208_v18 }
  0x1a   :  { %213 = vmatprep.subr.bf16.mxu0 %v212_v21 }
  0x1d   :  { %215 = vmatpush3.bf16.msra.mxu0 %v212_v21 }
  0x1e   :  { %217 = vmatprep.subr.bf16.mxu0 %v216_v24 }
  0x21   :  { %219 = vmatpush3.bf16.msra.mxu0 %v216_v24 }
  0x24   :  { %186 = vmatmul.mubr.f32.vlgmr.msra.gmra.mrb[0].mxu0 %v16_v25 }
  0xf7   :  { %v187_v27 = vpop.f32.mrb[0].mxu0 }
  0xf8   :  { %v112_v28 = vadd.f32 %v187_v27, %v134_v26  ;;  %v106_v29 = vpop.f32.mrb[1].mxu0 }
  0xf9   :  { %v107_v30 = vadd.f32 %v134_v26, %v106_v29 }
  0xfa   :  { %117 = vst.msk [vmem:[#allocation2 + $0x8] sm:$0xff] %vm115_vm0, %v112_v28 }
  0xfb   :  { %116 = vst.msk [vmem:[#allocation2] sm:$0xff] %vm115_vm0, %v107_v30 }
  0xfc   :  { %234 = shalt.err (!%p231_p4)
}
  0xfd   :  { %s235_s2 = scalar_lea.hbm %s342_s3, 256 }
  0xfe   :  { %p236_p5 = scmp.ne.s32.totalorder %s342_s3, %s235_s2  ;;  %p239_p6 = scmp.lt.u32.totalorder %s235_s2, %s342_s3 }
 0x100   :  { %p241_p7 = pnand %p239_p6, %p236_p5 }
 0x102   :  { %244 = shalt.err (!%p241_p7)
}
 0x103   :  { %s248_s30 = smov 128   ;;  %s249_s4 = smov 8  }
 0x104   :  { %129 = dma.vmem_to_hbm [thread:$0]  %s124_s24, 256, %s342_s3, [#allocation3], %s248_s30, %s248_s30, %s249_s4  }
 0x105   :  { %245 = dma.done.wait [#allocation3], 256  }
 0x106   :  { %246 = vsyncadd [#allocation3], 4294967040 }
 0x107   :  { %133 = vsyncpa [#allocation3], 1 }

</bundles_post_ra>
